<compile_context>
chip_gen: v6e
topology: v6e:2x2x1
jax: 0.10.0
libtpu: 0.0.40
codegen_flags: <defaults>
</compile_context>

<pallas_src>
import jax
import jax.numpy as jnp
from jax.experimental import pallas as pl
from jax.experimental.pallas import tpu as pltpu

LANE = 128


def _round_up(n, m):
    return ((n + m - 1) // m) * m


def mlp_kernel(x_ref, w1_ref, b1_ref, w2_ref, b2_ref, w3_ref, b3_ref, o_ref):
    """Fused 3-layer MLP on one batch tile: relu(relu(x@W1+b1)@W2+b2)@W3+b3.

    Matmuls run on the MXU with f32 accumulation; bias add + ReLU stay in f32
    on the VPU (f32 elementwise is native on all of v5e/v6e/v7x)."""
    cdt = w1_ref.dtype  # compute dtype for MXU inputs (f32 or bf16)
    x = x_ref[...].astype(cdt)

    h1 = jnp.dot(x, w1_ref[...], preferred_element_type=jnp.float32)
    h1 = jnp.maximum(h1 + b1_ref[...].astype(jnp.float32), 0.0)

    h2 = jnp.dot(h1.astype(cdt), w2_ref[...], preferred_element_type=jnp.float32)
    h2 = jnp.maximum(h2 + b2_ref[...].astype(jnp.float32), 0.0)

    out = jnp.dot(h2.astype(cdt), w3_ref[...], preferred_element_type=jnp.float32)
    out = out + b3_ref[...].astype(jnp.float32)

    o_ref[...] = out.astype(o_ref.dtype)  # lane-dense (padded to 128-multiple) store


def mlp_forward(x, w1, b1, w2, b2, w3, b3, *, block_batch=256, compute_dtype=None):
    """Run the fused MLP kernel.

    - x: (B, input_dim), weights already transposed to (in, out), biases (1, out).
    - Batch is tiled into `block_batch`-row tiles (padded up if ragged); each
      grid step streams one x tile while weights stay resident in VMEM.
    - Output columns are zero-padded to a multiple of 128 inside the call and
      sliced back, so the kernel's store is lane-dense.
    - compute_dtype=jnp.bfloat16 casts x + weights for the MXU (f32 accumulate).
    """
    B, in_dim = x.shape
    out_dim = w3.shape[1]

    if compute_dtype is not None:
        x = x.astype(compute_dtype)
        w1 = w1.astype(compute_dtype)
        w2 = w2.astype(compute_dtype)
        w3 = w3.astype(compute_dtype)
    # biases stay f32: they are added after f32 accumulation.
    b1 = b1.astype(jnp.float32)
    b2 = b2.astype(jnp.float32)
    b3 = b3.astype(jnp.float32)

    # Lane-dense output: pad final layer columns to a multiple of 128.
    out_pad = _round_up(max(out_dim, LANE), LANE)
    if out_pad != out_dim:
        w3 = jnp.pad(w3, ((0, 0), (0, out_pad - out_dim)))
        b3 = jnp.pad(b3, ((0, 0), (0, out_pad - out_dim)))

    # Batch tile: multiple of 8 sublanes, no bigger than needed; pad ragged tail.
    tb = _round_up(min(block_batch, _round_up(B, 8)), 8)
    b_padded = _round_up(B, tb)
    if b_padded != B:
        x = jnp.pad(x, ((0, b_padded - B), (0, 0)))

    grid = (b_padded // tb,)

    def resident(shape):
        # Same block every grid step -> stays in VMEM, no re-DMA.
        return pl.BlockSpec(shape, lambda i: (0, 0))

    out = pl.pallas_call(
        mlp_kernel,
        out_shape=jax.ShapeDtypeStruct((b_padded, out_pad), jnp.float32),
        grid_spec=pltpu.PrefetchScalarGridSpec(
            num_scalar_prefetch=0,
            grid=grid,
            in_specs=[
                pl.BlockSpec((tb, in_dim), lambda i: (i, 0)),   # streamed x tile
                resident(w1.shape), resident(b1.shape),
                resident(w2.shape), resident(b2.shape),
                resident(w3.shape), resident(b3.shape),
            ],
            out_specs=pl.BlockSpec((tb, out_pad), lambda i: (i, 0)),
        ),
        compiler_params=pltpu.CompilerParams(
            # Independent batch tiles: shard across both TensorCores on v7x.
            dimension_semantics=("parallel",),
        ),
    )(x, w1, b1, w2, b2, w3, b3)

    return out[:B, :out_dim]


def init_linear(key, in_dim, out_dim, dtype=jnp.float32):
    """Deterministic init mimicking nn.Linear's uniform(-1/sqrt(in), 1/sqrt(in)).
    Weight returned already transposed to (in_dim, out_dim)."""
    kw, kb = jax.random.split(key)
    bound = 1.0 / jnp.sqrt(jnp.asarray(in_dim, dtype))
    w = jax.random.uniform(kw, (in_dim, out_dim), dtype, -bound, bound)
    b = jax.random.uniform(kb, (1, out_dim), dtype, -bound, bound)
    return w, b


def reference_mlp(x, w1, b1, w2, b2, w3, b3):
    h1 = jnp.maximum(x @ w1 + b1, 0.0)
    h2 = jnp.maximum(h1 @ w2 + b2, 0.0)
    return h2 @ w3 + b3


if __name__ == "__main__":
    # Shapes consistent with the module defaults (hidden_dims=[128,128]); the
    # quirky layer construction requires input_dim == hidden_dims[i].
    batch = 500            # intentionally NOT a multiple of the tile (tests tail path)
    input_dim = 128
    hidden_dims = [128, 128]
    output_dim = 16

    key = jax.random.PRNGKey(0)
    kx, k1, k2, k3 = jax.random.split(key, 4)

    x = jax.random.normal(kx, (batch, input_dim), jnp.float32)

    # Mirrors the PyTorch module exactly:
    #   Linear(input_dim, hidden_dims[0]) -> ReLU ->
    #   Linear(input_dim, hidden_dims[1]) -> ReLU ->
    #   Linear(hidden_dims[-1], output_dim)
    w1, b1 = init_linear(k1, input_dim, hidden_dims[0])
    w2, b2 = init_linear(k2, input_dim, hidden_dims[1])
    w3, b3 = init_linear(k3, hidden_dims[-1], output_dim)

    ref = reference_mlp(x, w1, b1, w2, b2, w3, b3)

    # f32 path: exact match against the JAX reference.
    out_f32 = jax.block_until_ready(
        mlp_forward(x, w1, b1, w2, b2, w3, b3, block_batch=256))
    assert out_f32.shape == (batch, output_dim)
    assert jnp.allclose(out_f32, ref, atol=1e-5, rtol=1e-5), "f32 mismatch vs reference"

    # bf16 compute path (v6e/v7x MXU-friendly): f32 accumulation, loose tolerance.
    out_bf16 = jax.block_until_ready(
        mlp_forward(x, w1, b1, w2, b2, w3, b3, block_batch=256,
                    compute_dtype=jnp.bfloat16))
    assert out_bf16.shape == (batch, output_dim)
    max_err = float(jnp.max(jnp.abs(out_bf16 - ref)))
    assert max_err < 0.1, f"bf16 mismatch vs reference (max abs err {max_err})"

    print("KERNEL_OK")
</pallas_src>

<mosaic_0001>
module attributes {stable_mosaic.version = 11 : i64} {
  func.func @mlp_kernel(%arg0: i32, %arg1: memref<256x128xf32, #tpu.memory_space<vmem>>, %arg2: memref<128x128xf32, #tpu.memory_space<vmem>>, %arg3: memref<1x128xf32, #tpu.memory_space<vmem>>, %arg4: memref<128x128xf32, #tpu.memory_space<vmem>>, %arg5: memref<1x128xf32, #tpu.memory_space<vmem>>, %arg6: memref<128x128xf32, #tpu.memory_space<vmem>>, %arg7: memref<1x128xf32, #tpu.memory_space<vmem>>, %arg8: memref<256x128xf32, #tpu.memory_space<vmem>>) attributes {dimension_semantics = [#tpu.dimension_semantics<parallel>], iteration_bounds = array<i64: 2>, scalar_prefetch = 0 : i64, scratch_operands = 0 : i64, tpu.core_type = #tpu.core_type<tc>, window_params = [{transform_indices = @transform_0, window_bounds = array<i64: 256, 128>}, {pipeline_mode = #tpu.pipeline_mode<synchronous>, transform_indices = @transform_1, window_bounds = array<i64: 128, 128>}, {pipeline_mode = #tpu.pipeline_mode<synchronous>, transform_indices = @transform_2, window_bounds = array<i64: 1, 128>}, {pipeline_mode = #tpu.pipeline_mode<synchronous>, transform_indices = @transform_3, window_bounds = array<i64: 128, 128>}, {pipeline_mode = #tpu.pipeline_mode<synchronous>, transform_indices = @transform_4, window_bounds = array<i64: 1, 128>}, {pipeline_mode = #tpu.pipeline_mode<synchronous>, transform_indices = @transform_5, window_bounds = array<i64: 128, 128>}, {pipeline_mode = #tpu.pipeline_mode<synchronous>, transform_indices = @transform_6, window_bounds = array<i64: 1, 128>}, {transform_indices = @transform_7, window_bounds = array<i64: 256, 128>}]} {
    %c0 = arith.constant 0 : index
    %c0_0 = arith.constant 0 : index
    %0 = vector.load %arg1[%c0, %c0_0] : memref<256x128xf32, #tpu.memory_space<vmem>>, vector<256x128xf32>
    %c0_1 = arith.constant 0 : index
    %c0_2 = arith.constant 0 : index
    %1 = vector.load %arg2[%c0_1, %c0_2] : memref<128x128xf32, #tpu.memory_space<vmem>>, vector<128x128xf32>
    %cst = arith.constant dense<0.000000e+00> : vector<256x128xf32>
    %2 = tpu.matmul %0, %1, %cst {dimension_numbers = #tpu.dot_dimension_numbers<[1], [0], [0], [1], [0, 0, 1, 1], [], []>} : vector<256x128xf32>, vector<128x128xf32>, vector<256x128xf32> -> vector<256x128xf32>
    %c0_3 = arith.constant 0 : index
    %c0_4 = arith.constant 0 : index
    %3 = vector.load %arg3[%c0_3, %c0_4] : memref<1x128xf32, #tpu.memory_space<vmem>>, vector<1x128xf32>
    %4 = vector.broadcast %3 : vector<1x128xf32> to vector<256x128xf32>
    %5 = arith.addf %2, %4 : vector<256x128xf32>
    %cst_5 = arith.constant 0.000000e+00 : f32
    %6 = vector.broadcast %cst_5 : f32 to vector<256x128xf32>
    %7 = arith.maximumf %5, %6 : vector<256x128xf32>
    %c0_6 = arith.constant 0 : index
    %c0_7 = arith.constant 0 : index
    %8 = vector.load %arg4[%c0_6, %c0_7] : memref<128x128xf32, #tpu.memory_space<vmem>>, vector<128x128xf32>
    %cst_8 = arith.constant dense<0.000000e+00> : vector<256x128xf32>
    %9 = tpu.matmul %7, %8, %cst_8 {dimension_numbers = #tpu.dot_dimension_numbers<[1], [0], [0], [1], [0, 0, 1, 1], [], []>} : vector<256x128xf32>, vector<128x128xf32>, vector<256x128xf32> -> vector<256x128xf32>
    %c0_9 = arith.constant 0 : index
    %c0_10 = arith.constant 0 : index
    %10 = vector.load %arg5[%c0_9, %c0_10] : memref<1x128xf32, #tpu.memory_space<vmem>>, vector<1x128xf32>
    %11 = vector.broadcast %10 : vector<1x128xf32> to vector<256x128xf32>
    %12 = arith.addf %9, %11 : vector<256x128xf32>
    %cst_11 = arith.constant 0.000000e+00 : f32
    %13 = vector.broadcast %cst_11 : f32 to vector<256x128xf32>
    %14 = arith.maximumf %12, %13 : vector<256x128xf32>
    %c0_12 = arith.constant 0 : index
    %c0_13 = arith.constant 0 : index
    %15 = vector.load %arg6[%c0_12, %c0_13] : memref<128x128xf32, #tpu.memory_space<vmem>>, vector<128x128xf32>
    %cst_14 = arith.constant dense<0.000000e+00> : vector<256x128xf32>
    %16 = tpu.matmul %14, %15, %cst_14 {dimension_numbers = #tpu.dot_dimension_numbers<[1], [0], [0], [1], [0, 0, 1, 1], [], []>} : vector<256x128xf32>, vector<128x128xf32>, vector<256x128xf32> -> vector<256x128xf32>
    %c0_15 = arith.constant 0 : index
    %c0_16 = arith.constant 0 : index
    %17 = vector.load %arg7[%c0_15, %c0_16] : memref<1x128xf32, #tpu.memory_space<vmem>>, vector<1x128xf32>
    %18 = vector.broadcast %17 : vector<1x128xf32> to vector<256x128xf32>
    %19 = arith.addf %16, %18 : vector<256x128xf32>
    %c0_17 = arith.constant 0 : index
    %c0_18 = arith.constant 0 : index
    %20 = vector.load %arg8[%c0_17, %c0_18] : memref<256x128xf32, #tpu.memory_space<vmem>>, vector<256x128xf32>
    tpu.vector_store %arg8[%c0_17, %c0_18], %19 {strides = array<i32>} : memref<256x128xf32, #tpu.memory_space<vmem>>, vector<256x128xf32>,
    return
  }
  func.func @transform_0(%arg0: i32) -> (i32, i32) {
    %c0_i32 = arith.constant 0 : i32
    %c0_i32_0 = arith.constant 0 : i32
    return %arg0, %c0_i32 : i32, i32
  }
  func.func @transform_1(%arg0: i32) -> (i32, i32) {
    %c0_i32 = arith.constant 0 : i32
    %c0_i32_0 = arith.constant 0 : i32
    %c0_i32_1 = arith.constant 0 : i32
    return %c0_i32, %c0_i32_0 : i32, i32
  }
  func.func @transform_2(%arg0: i32) -> (i32, i32) {
    %c0_i32 = arith.constant 0 : i32
    %c0_i32_0 = arith.constant 0 : i32
    %c0_i32_1 = arith.constant 0 : i32
    return %c0_i32, %c0_i32_0 : i32, i32
  }
  func.func @transform_3(%arg0: i32) -> (i32, i32) {
    %c0_i32 = arith.constant 0 : i32
    %c0_i32_0 = arith.constant 0 : i32
    %c0_i32_1 = arith.constant 0 : i32
    return %c0_i32, %c0_i32_0 : i32, i32
  }
  func.func @transform_4(%arg0: i32) -> (i32, i32) {
    %c0_i32 = arith.constant 0 : i32
    %c0_i32_0 = arith.constant 0 : i32
    %c0_i32_1 = arith.constant 0 : i32
    return %c0_i32, %c0_i32_0 : i32, i32
  }
  func.func @transform_5(%arg0: i32) -> (i32, i32) {
    %c0_i32 = arith.constant 0 : i32
    %c0_i32_0 = arith.constant 0 : i32
    %c0_i32_1 = arith.constant 0 : i32
    return %c0_i32, %c0_i32_0 : i32, i32
  }
  func.func @transform_6(%arg0: i32) -> (i32, i32) {
    %c0_i32 = arith.constant 0 : i32
    %c0_i32_0 = arith.constant 0 : i32
    %c0_i32_1 = arith.constant 0 : i32
    return %c0_i32, %c0_i32_0 : i32, i32
  }
  func.func @transform_7(%arg0: i32) -> (i32, i32) {
    %c0_i32 = arith.constant 0 : i32
    %c0_i32_0 = arith.constant 0 : i32
    return %arg0, %c0_i32 : i32, i32
  }
}

</mosaic_0001>

<bundles_post_ra>
// kernel: tpu_custom_call.1
= control target key start
LH: loop header
LB: loop body
LE: loop exit
PB: predicated region body
PF: predicated region fallthrough
CT: control target
= control target key end

     0   :  { %s2487_s0 = inlined_call_operand.hbm [shape: f32[512,128], index: 0, kind: input, shape index: {}]   ;;  %s2488_s1 = inlined_call_operand.hbm [shape: f32[128,128], index: 1, kind: input, shape index: {}]   ;;  %s2489_s2 = inlined_call_operand.vmem [shape: f32[1,128], index: 2, kind: input, shape index: {}]   ;;  %s2490_s3 = inlined_call_operand.hbm [shape: f32[128,128], index: 3, kind: input, shape index: {}]   ;;  %s2491_s4 = inlined_call_operand.vmem [shape: f32[1,128], index: 4, kind: input, shape index: {}]   ;;  %s2492_s5 = inlined_call_operand.hbm [shape: f32[128,128], index: 5, kind: input, shape index: {}]   ;;  %s2493_s6 = inlined_call_operand.vmem [shape: f32[1,128], index: 6, kind: input, shape index: {}]   ;;  %s2494_s7 = inlined_call_operand.hbm [shape: f32[512,128], index: 7, kind: output, shape index: {}]  }
   0x1   :  { %2501 = sst [smem:[#allocation15_spill]] %s2488_s1 }
   0x2   :  { %12 = vsyncpa [#allocation3], 0 }
   0x3   :  { %14 = vsyncpa [#allocation3 + $0x1], 0 }
   0x4   :  { %15 = vsyncpa [#allocation6], 0 }
   0x5   :  { %16 = vsyncpa [#allocation9], 0 }
   0x6   :  { %17 = vsyncpa [#allocation4], 0 }
   0x7   :  { %19 = vsyncpa [#allocation4 + $0x1], 0  ;;  %s2082_s24 = smov 0   ;;  %s2084_s25 = smov 0  }
   0x8   :  { %s2086_s26 = smov 0   ;;  %s2088_s27 = smov 0  }
   0x9 LB: > { %s2103_s28 = sadd.s32 4294967295, %s2031_s27   ;;  %s1331_s29 = sadd.s32 4294967294, %s2031_s27   ;;  %s2031_s27 = sphi %s2088_s27, %s2523_s27   ;;  %s2027_s26 = sphi %s2086_s26, %s2522_s26   ;;  %s2023_s25 = sphi %s2084_s25, %s2521_s25   ;;  %s2019_s24 = sphi %s2082_s24, %s2520_s24  }
   0xa   : > { %p45_p0 = scmp.ne.s32.totalorder %s2023_s25, %s2019_s24  ;;  %p2495_p1 = scmp.eq.s32.totalorder %s2103_s28, 0 }
   0xb   : > { %p195_p2 = scmp.eq.s32.totalorder %s2103_s28, 1  ;;  %p201_p3 = scmp.eq.s32.totalorder %s1331_s29, 1 }
   0xc   : > { %p2112_p4 = por %p2495_p1, %p45_p0  ;;  %p1332_p5 = scmp.ge.s32.totalorder %s2031_s27, 1 }
   0xd   : > { %p2117_p6 = por %p201_p3, %p45_p0  ;;  %p208_p7 = scmp.lt.s32.totalorder %s2031_s27, 3 }
   0xe   : > { %s2502_s30 = scalar_select %p2112_p4, 1, 0 }
   0xf   : > { %s2503_s8 = scalar_select %p2117_p6, 1, 0 }
  0x10   : > { %p2122_p8 = pnand %p1332_p5, %p208_p7  ;;  %s2033_s10 = smov [#allocation5]  }
  0x11   : > { %s220_s11 = sshll.u32 %s2033_s10, 4  ;;  %s2034_s13 = smov [#allocation7]   ;;  %s221_s11 = int_to_ptr.vmem [resolvable:$true] %s220_s11 }
  0x12   : > { %s2504_s9 = scalar_select %p2122_p8, 1, 0 }
  0x13   : > { %p1788_p9 = pneg %p2122_p8  ;;  %s236_s14 = sshll.u32 %s2034_s13, 4  ;;  %s237_s14 = int_to_ptr.vmem [resolvable:$true] %s236_s14 }
  0x14   : > { %s2035_s15 = smov [#allocation8]   ;;  %s1864_s17 = scalar_lea.vmem %s221_s11, 2048 }
  0x15   : > { %p2131_p11 = pnand %p1788_p9, %p2495_p1  ;;  %s252_s16 = sshll.u32 %s2035_s15, 4  ;;  %s253_s16 = int_to_ptr.vmem [resolvable:$true] %s252_s16 }
  0x16   : > { %p1865_p13 = scmp.ne.s32.totalorder %s221_s11, %s1864_s17  ;;  %p1872_p5 = scmp.lt.s32.totalorder %s221_s11, %s221_s11 }
  0x17   : > { %p1855_p12 = pneg %p2131_p11  ;;  %p1873_p7 = scmp.lt.s32.totalorder %s1864_s17, %s1864_s17 }
  0x19   : > { %p1867_p0 = pnand %p1865_p13, %p1855_p12  ;;  %p1874_p9 = por %p1873_p7, %p1872_p5 }
  0x1b   : > { %p1868_p3 = pneg %p1867_p0 }
  0x1d   : > { %p1875_p10 = pnand %p1874_p9, %p1868_p3 }
  0x1f   : > { %1878 = shalt.err (!%p1875_p10)
}
  0x20   : > { %s2496_s18 = smov 128   ;;  %s2497_s19 = smov 8  }
  0x21   : > { %s2506_s1 = sld [smem:[#allocation15_spill]]  ;;  %s1890_s22 = scalar_lea.vmem %s237_s14, 2048 }
  0x22   : > { %p1891_p13 = scmp.ne.s32.totalorder %s237_s14, %s1890_s22  ;;  %p1898_p3 = scmp.lt.s32.totalorder %s237_s14, %s237_s14 }
  0x23   : > { %p1899_p10 = scmp.lt.s32.totalorder %s1890_s22, %s1890_s22 }
  0x24   : > { %p1893_p0 = pnand %p1891_p13, %p1855_p12 }
  0x25   : > { %p1900_p7 = por %p1899_p10, %p1898_p3 }
  0x26   : > { %p1894_p5 = pneg %p1893_p0 }
  0x27   : > { %1791 = dma.hbm_to_vmem [thread:$0]  (!%p2131_p11), %s2506_s1, 2048, %s221_s11, [#allocation6], %s2496_s18, %s2496_s18, %s2497_s19  }
  0x28   : > { %p1901_p9 = pnand %p1900_p7, %p1894_p5 }
  0x2a   : > { %1904 = shalt.err (!%p1901_p9)
}
  0x2b   : > { %1794 = dma.hbm_to_vmem [thread:$0]  (!%p2131_p11), %s2490_s3, 2048, %s237_s14, [#allocation6], %s2496_s18, %s2496_s18, %s2497_s19  }
  0x2c   : > { %s1916_s10 = scalar_lea.vmem %s253_s16, 2048  ;;  %p1924_p3 = scmp.lt.s32.totalorder %s253_s16, %s253_s16 }
  0x2d   : > { %p1917_p1 = scmp.ne.s32.totalorder %s253_s16, %s1916_s10  ;;  %p1925_p5 = scmp.lt.s32.totalorder %s1916_s10, %s1916_s10 }
  0x2f   : > { %p1919_p13 = pnand %p1917_p1, %p1855_p12  ;;  %p1926_p10 = por %p1925_p5, %p1924_p3 }
  0x31   : > { %p1920_p0 = pneg %p1919_p13 }
  0x33   : > { %p1927_p7 = pnand %p1926_p10, %p1920_p0 }
  0x35   : > { %1930 = shalt.err (!%p1927_p7)
}
  0x36   : > { %1797 = dma.hbm_to_vmem [thread:$0]  (!%p2131_p11), %s2492_s5, 2048, %s253_s16, [#allocation9], %s2496_s18, %s2496_s18, %s2497_s19  }
  0x37   : > { %s2171_s14 = sadd.s32 1, %s2031_s27   ;;  %s32_s15 = sadd.s32 1, %s2027_s26 }
  0x38   : > { %s29_s12 = ssub.s32 %s2031_s27, %s2171_s14  ;;  %p39_p12 = scmp.ne.s32.totalorder %s2027_s26, %s2023_s25 }
  0x39   : > { %p30_p1 = scmp.eq.s32.totalorder %s29_s12, 0  ;;  %p40_p9 = scmp.eq.s32.totalorder %s2031_s27, 0 }
  0x3a   : > { %p1809_p13 = scmp.lt.s32.totalorder %s2031_s27, 2  ;;  %p2185_p3 = por %p195_p2, %p39_p12 }
  0x3b   : > { %s2181_s17 = scalar_select %p30_p1, %s2027_s26, %s32_s15  }
  0x3c   : > { %p41_p0 = por %p40_p9, %p39_p12  ;;  %s269_s21 = sand.u32 1, %s2027_s26  }
  0x3d   : > { %s2507_s20 = scalar_select %p2185_p3, 1, 0 }
  0x3e   : > { %s1354_s22 = sshll.u32 %s2031_s27, 12  ;;  %s1337_s16 = sshll.u32 %s269_s21, 8 }
  0x3f   : > { %s2194_s10 = scalar_lea.hbm %s2487_s0, %s1354_s22  ;;  %s273_s11 = scalar_lea.vmem [#allocation2], %s1337_s16 }
  0x40   : > { %s280_s13 = sshll.u32 %s273_s11, 4  ;;  %p2196_p11 = pnand %p1809_p13, %p41_p0  ;;  %s2200_s13 = int_to_ptr.vmem [resolvable:$true] %s280_s13 }
  0x41   : > { %s2202_s15 = scalar_lea.sflag [#allocation3], %s269_s21  ;;  %s1931_s18 = scalar_lea.hbm %s2194_s10, 4096 }
  0x42   : > { %p1932_p2 = scmp.ne.s32.totalorder %s2194_s10, %s1931_s18  ;;  %p1933_p5 = pneg %p2196_p11 }
  0x43   : > { %s1936_s16 = scalar_lea.hbm %s2487_s0, 8192  ;;  %p1937_p1 = scmp.lt.s32.totalorder %s2194_s10, %s2487_s0 }
  0x44   : > { %p1934_p10 = pnand %p1933_p5, %p1932_p2  ;;  %p1938_p12 = scmp.lt.s32.totalorder %s1936_s16, %s1931_s18 }
  0x46   : > { %p1935_p7 = pneg %p1934_p10  ;;  %p1939_p9 = por %p1938_p12, %p1937_p1 }
  0x48   : > { %p1940_p13 = pnand %p1939_p9, %p1935_p7 }
  0x4a   : > { %1943 = shalt.err (!%p1940_p13)
}
  0x4b   : > { %s1944_s21 = scalar_lea.vmem %s2200_s13, 4096  ;;  %s2038_s19 = smov [#allocation2]  }
  0x4c   : > { %p1945_p0 = scmp.ne.s32.totalorder %s2200_s13, %s1944_s21  ;;  %s1949_s1 = sshll.u32 %s2038_s19, 4  ;;  %s1950_s1 = int_to_ptr.vmem [resolvable:$false] %s1949_s1 }
  0x4d   : > { %s1951_s22 = scalar_lea.vmem %s1950_s1, 8192  ;;  %p1952_p10 = scmp.lt.s32.totalorder %s2200_s13, %s1950_s1 }
  0x4e   : > { %p1947_p6 = pnand %p1945_p0, %p1933_p5  ;;  %p1953_p3 = scmp.lt.s32.totalorder %s1951_s22, %s1944_s21 }
  0x50   : > { %p1948_p2 = pneg %p1947_p6  ;;  %p1954_p4 = por %p1953_p3, %p1952_p10 }
  0x52   : > { %p1955_p8 = pnand %p1954_p4, %p1948_p2 }
  0x54   : > { %1958 = shalt.err (!%p1955_p8)
}
  0x55   : > { %s2509_s18 = smov 8   ;;  %s2510_s23 = smov 128  }
  0x56   : > { %1801 = dma.hbm_to_vmem [thread:$0]  (!%p2196_p11), %s2194_s10, 4096, %s2200_s13, %s2202_s15, %s2510_s23, %s2510_s23, %s2509_s18  }
  0x57   : > { %p2511_p6 = scmp.ne.s32.totalorder %s2504_s9, 0 }
  0x58   : > { %s2229_s19 = sand.u32 (!%p2511_p6), 1, %s2023_s25   ;;  %p2512_p4 = scmp.ne.s32.totalorder (!%p2511_p6), %s2502_s30, 0 }
  0x59   : > { %292 = sbr.rel (%p2511_p6) target bundleno = 806 (0x326), region = 48  ;;  %s1341_s1 = sshll.u32 (!%p2511_p6), %s2229_s19, 8 }
  0x5a   : > { %s295_s16 = scalar_lea.sflag (!%p2511_p6), [#allocation3], %s2229_s19  ;;  %s2235_s12 = scalar_lea.vmem (!%p2511_p6), [#allocation2], %s1341_s1 }
  0x5e   : > { %2002 = dma.done.wait (%p2512_p4), %s295_s16, 4096  }
  0x5f   : > { %2004 = vsyncadd (%p2512_p4), %s295_s16, 4294963200  ;;  %p2513_p8 = scmp.eq.s32.totalorder %s2103_s28, 0 }
  0x61   : > { %2006 = dma.done.wait (%p2513_p8), [#allocation6], 4096   ;;  %p2514_p3 = pmov %p2513_p8 }
  0x63   : > { %2008 = vsyncadd (%p2514_p3), [#allocation6], 4294963200  ;;  %p2515_p11 = pmov %p2514_p3 }
  0x64   : > { %p2516_p5 = pmov %p2514_p3 }
  0x65   : > { %2010 = dma.done.wait (%p2515_p11), [#allocation9], 2048  }
  0x66   : > { %2012 = vsyncadd (%p2516_p5), [#allocation9], 4294965248  ;;  %v390_v0 = vld [vmem:[#allocation5 + $0x78] sm:$0xff]  ;;  %v389_v1 = vld [vmem:[#allocation5 + $0x70] sm:$0xff]  ;;  %s2372_s11 = scalar_lea.vmem [#allocation10], %s1341_s1  ;;  %s1355_s21 = sshll.u32 %s2103_s28, 12 }
  0x67   : > { %1500 = vmatprep.subr.mxu0 %v390_v0  ;;  %1740 = vmatprep.subr.mxu1 %v390_v0  ;;  %v388_v2 = vld [vmem:[#allocation5 + $0x68] sm:$0xff]  ;;  %v387_v3 = vld [vmem:[#allocation5 + $0x60] sm:$0xff]  ;;  %v386_v5 = vld [vmem:[#allocation5 + $0x58] sm:$0xff]  ;;  %s1229_s22 = sshll.u32 %s2372_s11, 4  ;;  %s2439_s1 = scalar_lea.hbm %s2494_s7, %s1355_s21  ;;  %s2441_s22 = int_to_ptr.vmem [resolvable:$true] %s1229_s22 }
  0x68   : > { %1501 = vmatpush3.msra.mxu0 %v390_v0  ;;  %1756 = vmatpush3.msra.mxu1 %v390_v0  ;;  %v343_v4 = vld [vmem:[%s2235_s12] sm:$0xff]  ;;  %v385_v6 = vld [vmem:[#allocation5 + $0x50] sm:$0xff]  ;;  %v384_v7 = vld [vmem:[#allocation5 + $0x48] sm:$0xff]  ;;  %s1216_s28 = scalar_lea.sflag [#allocation4], %s2229_s19  ;;  %s1959_s16 = scalar_lea.vmem %s2441_s22, 4096 }
  0x69   : > { %1502 = vmatprep.subr.mxu0 %v389_v1  ;;  %1741 = vmatprep.subr.mxu1 %v389_v1  ;;  %v383_v8 = vld [vmem:[#allocation5 + $0x40] sm:$0xff]  ;;  %v382_v9 = vld [vmem:[#allocation5 + $0x38] sm:$0xff]  ;;  %v381_v10 = vld [vmem:[#allocation5 + $0x30] sm:$0xff]  ;;  %p1960_p7 = scmp.ne.s32.totalorder %s2441_s22, %s1959_s16  ;;  %p2517_p1 = scmp.ne.s32.totalorder %s2507_s20, 0 }
  0x6a   : > { %1503 = vmatpush3.msra.mxu0 %v389_v1  ;;  %1757 = vmatpush3.msra.mxu1 %v389_v1  ;;  %v380_v11 = vld [vmem:[#allocation5 + $0x28] sm:$0xff]  ;;  %v379_v12 = vld [vmem:[#allocation5 + $0x20] sm:$0xff]  ;;  %v378_v13 = vld [vmem:[#allocation5 + $0x18] sm:$0xff] }
  0x6b   : > { %1504 = vmatprep.subr.mxu0 %v388_v2  ;;  %1742 = vmatprep.subr.mxu1 %v388_v2  ;;  %v377_v14 = vld [vmem:[#allocation5 + $0x10] sm:$0xff]  ;;  %v376_v15 = vld [vmem:[#allocation5 + $0x8] sm:$0xff]  ;;  %v375_v16 = vld [vmem:[#allocation5] sm:$0xff]  ;;  %p1961_p12 = pnand %p1960_p7, %p2517_p1 }
  0x6c   : > { %1505 = vmatpush3.msra.mxu0 %v388_v2  ;;  %1532 = vmatprep.mubr.f32.mxu0 %v343_v4  ;;  %v344_v17 = vld [vmem:[%s2235_s12 + $0x8] sm:$0xff]  ;;  %v345_v18 = vld [vmem:[%s2235_s12 + $0x10] sm:$0xff]  ;;  %v359_v19 = vld [vmem:[%s2235_s12 + $0x80] sm:$0xff] }
  0x6d   : > { %1506 = vmatprep.subr.mxu0 %v387_v3  ;;  %1758 = vmatpush3.msra.mxu1 %v388_v2  ;;  %v360_v20 = vld [vmem:[%s2235_s12 + $0x88] sm:$0xff]  ;;  %v670_v21 = vld [vmem:[#allocation7 + $0x78] sm:$0xff]  ;;  %v361_v22 = vld [vmem:[%s2235_s12 + $0x90] sm:$0xff]  ;;  %p1962_p9 = pneg %p1961_p12 }
  0x6e   : > { %1507 = vmatpush3.msra.mxu0 %v387_v3  ;;  %1743 = vmatprep.subr.mxu1 %v387_v3  ;;  %v346_v23 = vld [vmem:[%s2235_s12 + $0x18] sm:$0xff]  ;;  %v669_v24 = vld [vmem:[#allocation7 + $0x70] sm:$0xff]  ;;  %v347_v25 = vld [vmem:[%s2235_s12 + $0x20] sm:$0xff] }
  0x6f   : > { %1508 = vmatprep.subr.mxu0 %v386_v5  ;;  %1759 = vmatpush3.msra.mxu1 %v387_v3  ;;  %v362_v26 = vld [vmem:[%s2235_s12 + $0x98] sm:$0xff]  ;;  %v668_v27 = vld [vmem:[#allocation7 + $0x68] sm:$0xff]  ;;  %v363_v28 = vld [vmem:[%s2235_s12 + $0xa0] sm:$0xff] }
  0x70   : > { %1509 = vmatpush3.msra.mxu0 %v386_v5  ;;  %1744 = vmatprep.subr.mxu1 %v386_v5  ;;  %v348_v29 = vld [vmem:[%s2235_s12 + $0x28] sm:$0xff]  ;;  %v667_v30 = vld [vmem:[#allocation7 + $0x60] sm:$0xff]  ;;  %v349_v31 = vld [vmem:[%s2235_s12 + $0x30] sm:$0xff] }
  0x71   : > { %1510 = vmatprep.subr.mxu0 %v385_v6  ;;  %1760 = vmatpush3.msra.mxu1 %v386_v5  ;;  %v364_v32 = vld [vmem:[%s2235_s12 + $0xa8] sm:$0xff]  ;;  %v666_v33 = vld [vmem:[#allocation7 + $0x58] sm:$0xff]  ;;  %v365_v34 = vld [vmem:[%s2235_s12 + $0xb0] sm:$0xff] }
  0x72   : > { %1511 = vmatpush3.msra.mxu0 %v385_v6  ;;  %1745 = vmatprep.subr.mxu1 %v385_v6  ;;  %v350_v35 = vld [vmem:[%s2235_s12 + $0x38] sm:$0xff]  ;;  %v665_v36 = vld [vmem:[#allocation7 + $0x50] sm:$0xff]  ;;  %v351_v37 = vld [vmem:[%s2235_s12 + $0x40] sm:$0xff] }
  0x73   : > { %1512 = vmatprep.subr.mxu0 %v384_v7  ;;  %1761 = vmatpush3.msra.mxu1 %v385_v6  ;;  %v366_v38 = vld [vmem:[%s2235_s12 + $0xb8] sm:$0xff]  ;;  %v664_v39 = vld [vmem:[#allocation7 + $0x48] sm:$0xff]  ;;  %v367_v40 = vld [vmem:[%s2235_s12 + $0xc0] sm:$0xff] }
  0x74   : > { %1513 = vmatpush3.msra.mxu0 %v384_v7  ;;  %1746 = vmatprep.subr.mxu1 %v384_v7  ;;  %v352_v41 = vld [vmem:[%s2235_s12 + $0x48] sm:$0xff]  ;;  %v663_v42 = vld [vmem:[#allocation7 + $0x40] sm:$0xff]  ;;  %v353_v43 = vld [vmem:[%s2235_s12 + $0x50] sm:$0xff] }
  0x75   : > { %1514 = vmatprep.subr.mxu0 %v383_v8  ;;  %1762 = vmatpush3.msra.mxu1 %v384_v7  ;;  %v368_v44 = vld [vmem:[%s2235_s12 + $0xc8] sm:$0xff]  ;;  %v662_v45 = vld [vmem:[#allocation7 + $0x38] sm:$0xff]  ;;  %v369_v46 = vld [vmem:[%s2235_s12 + $0xd0] sm:$0xff] }
  0x76   : > { %1515 = vmatpush3.msra.mxu0 %v383_v8  ;;  %1747 = vmatprep.subr.mxu1 %v383_v8  ;;  %v354_v47 = vld [vmem:[%s2235_s12 + $0x58] sm:$0xff]  ;;  %v661_v48 = vld [vmem:[#allocation7 + $0x30] sm:$0xff]  ;;  %v355_v49 = vld [vmem:[%s2235_s12 + $0x60] sm:$0xff] }
  0x77   : > { %1516 = vmatprep.subr.mxu0 %v382_v9  ;;  %1763 = vmatpush3.msra.mxu1 %v383_v8  ;;  %v370_v50 = vld [vmem:[%s2235_s12 + $0xd8] sm:$0xff]  ;;  %v660_v51 = vld [vmem:[#allocation7 + $0x28] sm:$0xff]  ;;  %v371_v52 = vld [vmem:[%s2235_s12 + $0xe0] sm:$0xff] }
  0x78   : > { %1517 = vmatpush3.msra.mxu0 %v382_v9  ;;  %1748 = vmatprep.subr.mxu1 %v382_v9  ;;  %v356_v53 = vld [vmem:[%s2235_s12 + $0x68] sm:$0xff]  ;;  %v659_v54 = vld [vmem:[#allocation7 + $0x20] sm:$0xff]  ;;  %v357_v55 = vld [vmem:[%s2235_s12 + $0x70] sm:$0xff] }
  0x79   : > { %1518 = vmatprep.subr.mxu0 %v381_v10  ;;  %1764 = vmatpush3.msra.mxu1 %v382_v9  ;;  %v372_v56 = vld [vmem:[%s2235_s12 + $0xe8] sm:$0xff]  ;;  %v658_v57 = vld [vmem:[#allocation7 + $0x18] sm:$0xff]  ;;  %v373_v58 = vld [vmem:[%s2235_s12 + $0xf0] sm:$0xff] }
  0x7a   : > { %1519 = vmatpush3.msra.mxu0 %v381_v10  ;;  %1749 = vmatprep.subr.mxu1 %v381_v10  ;;  %v358_v59 = vld [vmem:[%s2235_s12 + $0x78] sm:$0xff]  ;;  %v657_v61 = vld [vmem:[#allocation7 + $0x10] sm:$0xff]  ;;  %v656_v62 = vld [vmem:[#allocation7 + $0x8] sm:$0xff] }
  0x7b   : > { %1520 = vmatprep.subr.mxu0 %v380_v11  ;;  %1765 = vmatpush3.msra.mxu1 %v381_v10  ;;  %v374_v60 = vld [vmem:[%s2235_s12 + $0xf8] sm:$0xff]  ;;  %v655_v63 = vld [vmem:[#allocation7] sm:$0xff]  ;;  %v949_v1 = vld [vmem:[#allocation8 + $0x70] sm:$0xff]  ;;  %s2039_s12 = smov [#allocation10]  }
  0x7c   : > { %1521 = vmatpush3.msra.mxu0 %v380_v11  ;;  %1750 = vmatprep.subr.mxu1 %v380_v11  ;;  %v950_v0 = vld [vmem:[#allocation8 + $0x78] sm:$0xff]  ;;  %v948_v2 = vld [vmem:[#allocation8 + $0x68] sm:$0xff]  ;;  %v947_v3 = vld [vmem:[#allocation8 + $0x60] sm:$0xff]  ;;  %s1963_s30 = sshll.u32 %s2039_s12, 4  ;;  %s1964_s30 = int_to_ptr.vmem [resolvable:$false] %s1963_s30 }
  0x7d   : > { %1522 = vmatprep.subr.mxu0 %v379_v12  ;;  %1766 = vmatpush3.msra.mxu1 %v380_v11  ;;  %v946_v4 = vld [vmem:[#allocation8 + $0x58] sm:$0xff]  ;;  %v945_v5 = vld [vmem:[#allocation8 + $0x50] sm:$0xff]  ;;  %v944_v6 = vld [vmem:[#allocation8 + $0x48] sm:$0xff]  ;;  %s1965_s9 = scalar_lea.vmem %s1964_s30, 8192  ;;  %p1966_p13 = scmp.lt.s32.totalorder %s2441_s22, %s1964_s30 }
  0x7e   : > { %1523 = vmatpush3.msra.mxu0 %v379_v12  ;;  %1751 = vmatprep.subr.mxu1 %v379_v12  ;;  %v943_v7 = vld [vmem:[#allocation8 + $0x40] sm:$0xff]  ;;  %v942_v8 = vld [vmem:[#allocation8 + $0x38] sm:$0xff]  ;;  %v941_v9 = vld [vmem:[#allocation8 + $0x30] sm:$0xff]  ;;  %p1967_p0 = scmp.lt.s32.totalorder %s1965_s9, %s1959_s16 }
  0x7f   : > { %1524 = vmatprep.subr.mxu0 %v378_v13  ;;  %1767 = vmatpush3.msra.mxu1 %v379_v12  ;;  %v940_v10 = vld [vmem:[#allocation8 + $0x28] sm:$0xff]  ;;  %v939_v11 = vld [vmem:[#allocation8 + $0x20] sm:$0xff]  ;;  %v938_v12 = vld [vmem:[#allocation8 + $0x18] sm:$0xff] }
  0x80   : > { %1525 = vmatpush3.msra.mxu0 %v378_v13  ;;  %1752 = vmatprep.subr.mxu1 %v378_v13  ;;  %p1968_p2 = por %p1967_p0, %p1966_p13 }
  0x81   : > { %1526 = vmatprep.subr.mxu0 %v377_v14  ;;  %1768 = vmatpush3.msra.mxu1 %v378_v13  ;;  %v2284_v13 = vld [vmem:[%s2489_s2] ss:$0 sm:$0xff] }
  0x82   : > { %1527 = vmatpush3.msra.mxu0 %v377_v14  ;;  %1753 = vmatprep.subr.mxu1 %v377_v14  ;;  %p1969_p10 = pnand %p1968_p2, %p1962_p9 }
  0x83   : > { %1528 = vmatprep.subr.mxu0 %v376_v15  ;;  %1769 = vmatpush3.msra.mxu1 %v377_v14 }
  0x84   : > { %1529 = vmatpush3.msra.mxu0 %v376_v15  ;;  %1754 = vmatprep.subr.mxu1 %v376_v15 }
  0x85   : > { %1530 = vmatprep.subr.mxu0 %v375_v16  ;;  %1770 = vmatpush3.msra.mxu1 %v376_v15 }
  0x86   : > { %1531 = vmatpush3.msra.mxu0 %v375_v16  ;;  %1755 = vmatprep.subr.mxu1 %v375_v16 }
  0x87   : > { %1533 = vmatmul.mubr.f32.vlgmr.msra.gmra.mxu0 %v344_v17  ;;  %1771 = vmatpush3.msra.mxu1 %v375_v16 }
  0x88   : > { %1535 = vmatprep.mubr.f32.mxu0 %v345_v18  ;;  %1556 = vmatprep.mubr.f32.mxu1 %v359_v19 }
  0x89   : > { %1557 = vmatmul.mubr.f32.vlgmr.msra.gmra.mxu1 %v360_v20  ;;  %1580 = vmatprep.subr.mxu1 %v670_v21 }
  0x8a   : > { %1559 = vmatprep.mubr.f32.mxu1 %v361_v22  ;;  %1581 = vmatpush3.msra.mxu1 %v670_v21 }
  0x8b   : > { %1536 = vmatmul.mubr.f32.gmra.mxu0 %v346_v23  ;;  %1582 = vmatprep.subr.mxu1 %v669_v24 }
  0x8c   : > { %1538 = vmatprep.mubr.f32.mxu0 %v347_v25  ;;  %1583 = vmatpush3.msra.mxu1 %v669_v24 }
  0x8d   : > { %1560 = vmatmul.mubr.f32.gmra.mxu1 %v362_v26  ;;  %1584 = vmatprep.subr.mxu1 %v668_v27 }
  0x8e   : > { %1562 = vmatprep.mubr.f32.mxu1 %v363_v28  ;;  %1585 = vmatpush3.msra.mxu1 %v668_v27 }
  0x8f   : > { %1539 = vmatmul.mubr.f32.gmra.mxu0 %v348_v29  ;;  %1586 = vmatprep.subr.mxu1 %v667_v30 }
  0x90   : > { %1541 = vmatprep.mubr.f32.mxu0 %v349_v31  ;;  %1587 = vmatpush3.msra.mxu1 %v667_v30 }
  0x91   : > { %1563 = vmatmul.mubr.f32.gmra.mxu1 %v364_v32  ;;  %1588 = vmatprep.subr.mxu1 %v666_v33 }
  0x92   : > { %1565 = vmatprep.mubr.f32.mxu1 %v365_v34  ;;  %1589 = vmatpush3.msra.mxu1 %v666_v33 }
  0x93   : > { %1542 = vmatmul.mubr.f32.gmra.mxu0 %v350_v35  ;;  %1590 = vmatprep.subr.mxu1 %v665_v36 }
  0x94   : > { %1544 = vmatprep.mubr.f32.mxu0 %v351_v37  ;;  %1591 = vmatpush3.msra.mxu1 %v665_v36 }
  0x95   : > { %1566 = vmatmul.mubr.f32.gmra.mxu1 %v366_v38  ;;  %1592 = vmatprep.subr.mxu1 %v664_v39 }
  0x96   : > { %1568 = vmatprep.mubr.f32.mxu1 %v367_v40  ;;  %1593 = vmatpush3.msra.mxu1 %v664_v39 }
  0x97   : > { %1545 = vmatmul.mubr.f32.gmra.mxu0 %v352_v41  ;;  %1594 = vmatprep.subr.mxu1 %v663_v42 }
  0x98   : > { %1547 = vmatprep.mubr.f32.mxu0 %v353_v43  ;;  %1595 = vmatpush3.msra.mxu1 %v663_v42 }
  0x99   : > { %1569 = vmatmul.mubr.f32.gmra.mxu1 %v368_v44  ;;  %1596 = vmatprep.subr.mxu1 %v662_v45 }
  0x9a   : > { %1571 = vmatprep.mubr.f32.mxu1 %v369_v46  ;;  %1597 = vmatpush3.msra.mxu1 %v662_v45 }
  0x9b   : > { %1548 = vmatmul.mubr.f32.gmra.mxu0 %v354_v47  ;;  %1598 = vmatprep.subr.mxu1 %v661_v48 }
  0x9c   : > { %1550 = vmatprep.mubr.f32.mxu0 %v355_v49  ;;  %1599 = vmatpush3.msra.mxu1 %v661_v48 }
  0x9d   : > { %1572 = vmatmul.mubr.f32.gmra.mxu1 %v370_v50  ;;  %1600 = vmatprep.subr.mxu1 %v660_v51 }
  0x9e   : > { %1574 = vmatprep.mubr.f32.mxu1 %v371_v52  ;;  %1601 = vmatpush3.msra.mxu1 %v660_v51 }
  0x9f   : > { %1551 = vmatmul.mubr.f32.gmra.mxu0 %v356_v53  ;;  %1602 = vmatprep.subr.mxu1 %v659_v54 }
  0xa0   : > { %1553 = vmatprep.mubr.f32.mxu0 %v357_v55  ;;  %1603 = vmatpush3.msra.mxu1 %v659_v54 }
  0xa1   : > { %1575 = vmatmul.mubr.f32.gmra.mxu1 %v372_v56  ;;  %1604 = vmatprep.subr.mxu1 %v658_v57 }
  0xa2   : > { %1577 = vmatprep.mubr.f32.mxu1 %v373_v58  ;;  %1605 = vmatpush3.msra.mxu1 %v658_v57 }
  0xa3   : > { %1554 = vmatmul.mubr.f32.gmra.mxu0 %v358_v59  ;;  %1606 = vmatprep.subr.mxu1 %v657_v61 }
  0xa4   : > { %1607 = vmatpush3.msra.mxu1 %v657_v61  ;;  %1660 = vmatprep.subr.mxu0 %v950_v0 }
  0xa5   : > { %1578 = vmatmul.mubr.f32.gmra.mxu1 %v374_v60  ;;  %1608 = vmatprep.subr.mxu1 %v656_v62 }
  0xa6   : > { %1609 = vmatpush3.msra.mxu1 %v656_v62  ;;  %1661 = vmatpush3.msra.mxu0 %v950_v0 }
  0xa7   : > { %1610 = vmatprep.subr.mxu1 %v655_v63  ;;  %1662 = vmatprep.subr.mxu0 %v949_v1 }
  0xa8   : > { %1611 = vmatpush3.msra.mxu1 %v655_v63  ;;  %1663 = vmatpush3.msra.mxu0 %v949_v1 }
  0xa9   : > { %1664 = vmatprep.subr.mxu0 %v948_v2 }
  0xaa   : > { %1665 = vmatpush3.msra.mxu0 %v948_v2 }
  0xab   : > { %1666 = vmatprep.subr.mxu0 %v947_v3 }
  0xac   : > { %1667 = vmatpush3.msra.mxu0 %v947_v3 }
  0xad   : > { %1668 = vmatprep.subr.mxu0 %v946_v4 }
  0xae   : > { %1669 = vmatpush3.msra.mxu0 %v946_v4 }
  0xaf   : > { %1670 = vmatprep.subr.mxu0 %v945_v5 }
  0xb0   : > { %1671 = vmatpush3.msra.mxu0 %v945_v5 }
  0xb1   : > { %1672 = vmatprep.subr.mxu0 %v944_v6 }
  0xb2   : > { %1673 = vmatpush3.msra.mxu0 %v944_v6 }
  0xb3   : > { %1674 = vmatprep.subr.mxu0 %v943_v7 }
  0xb4   : > { %1675 = vmatpush3.msra.mxu0 %v943_v7 }
  0xb5   : > { %1676 = vmatprep.subr.mxu0 %v942_v8 }
  0xb6   : > { %1677 = vmatpush3.msra.mxu0 %v942_v8 }
  0xb7   : > { %1678 = vmatprep.subr.mxu0 %v941_v9 }
  0xb8   : > { %1679 = vmatpush3.msra.mxu0 %v941_v9 }
  0xb9   : > { %1680 = vmatprep.subr.mxu0 %v940_v10 }
  0xba   : > { %1681 = vmatpush3.msra.mxu0 %v940_v10 }
  0xbb   : > { %1682 = vmatprep.subr.mxu0 %v939_v11 }
  0xbc   : > { %1683 = vmatpush3.msra.mxu0 %v939_v11 }
  0xbd   : > { %1684 = vmatprep.subr.mxu0 %v938_v12 }
  0xbe   : > { %1685 = vmatpush3.msra.mxu0 %v938_v12 }
 0x147   : > { %v1534_v14 = vpop.f32.mrf.mxu0 }
 0x148   : > { %v470_v15 = vadd.f32 %v1534_v14, %v2284_v13 }
 0x149   : > { %v464_v16 = vpop.f32.mrf.mxu0  ;;  %v2287_v17 = vpop.f32.mrf.mxu1 }
 0x14a   : > { %v465_v18 = vadd.f32 %v2284_v13, %v464_v16  ;;  %v624_v22 = vmax.f32 %v470_v15, 0.0  ;;  %v550_v11 = vadd.f32 %v2287_v17, %v2284_v13 }
 0x14b   : > { %v1537_v19 = vpop.f32.mrf.mxu0  ;;  %v544_v20 = vpop.f32.mrf.mxu1 }
 0x14c   : > { %v623_v21 = vmax.f32 %v465_v18, 0.0  ;;  %v480_v23 = vadd.f32 %v1537_v19, %v2284_v13  ;;  %v545_v1 = vadd.f32 %v2284_v13, %v544_v20  ;;  %v640_v16 = vmax.f32 %v550_v11, 0.0 }
 0x14d   : > { %v474_v24 = vpop.f32.mrf.mxu0  ;;  %v2291_v25 = vpop.f32.mrf.mxu1 }
 0x14e   : > { %v475_v26 = vadd.f32 %v2284_v13, %v474_v24  ;;  %1612 = vmatprep.mubr.f32.mxu1 %v623_v21  ;;  %v626_v30 = vmax.f32 %v480_v23, 0.0  ;;  %v639_v8 = vmax.f32 %v545_v1, 0.0  ;;  %v560_v18 = vadd.f32 %v2291_v25, %v2284_v13 }
 0x14f   : > { %v1540_v27 = vpop.f32.mrf.mxu0  ;;  %1613 = vmatmul.mubr.f32.vlgmr.msra.gmra.mxu1 %v624_v22  ;;  %v554_v28 = vpop.f32.mrf.mxu1 }
 0x150   : > { %v625_v29 = vmax.f32 %v475_v26, 0.0  ;;  %v490_v31 = vadd.f32 %v1540_v27, %v2284_v13  ;;  %v555_v9 = vadd.f32 %v2284_v13, %v554_v28  ;;  %v642_v22 = vmax.f32 %v560_v18, 0.0 }
 0x151   : > { %v484_v32 = vpop.f32.mrf.mxu0  ;;  %v2295_v33 = vpop.f32.mrf.mxu1 }
 0x152   : > { %v485_v34 = vadd.f32 %v2284_v13, %v484_v32  ;;  %1615 = vmatprep.mubr.f32.mxu1 %v625_v29  ;;  %v628_v37 = vmax.f32 %v490_v31, 0.0  ;;  %v641_v14 = vmax.f32 %v555_v9, 0.0  ;;  %v570_v17 = vadd.f32 %v2295_v33, %v2284_v13 }
 0x153   : > { %v1543_v35 = vpop.f32.mrf.mxu0  ;;  %1616 = vmatmul.mubr.f32.gmra.mxu1 %v626_v30  ;;  %v564_v40 = vpop.f32.mrf.mxu1 }
 0x154   : > { %v627_v36 = vmax.f32 %v485_v34, 0.0  ;;  %v500_v38 = vadd.f32 %v1543_v35, %v2284_v13  ;;  %v565_v15 = vadd.f32 %v2284_v13, %v564_v40  ;;  %v644_v27 = vmax.f32 %v570_v17, 0.0 }
 0x155   : > { %v494_v39 = vpop.f32.mrf.mxu0  ;;  %v1567_v47 = vpop.f32.mrf.mxu1 }
 0x156   : > { %v495_v41 = vadd.f32 %v2284_v13, %v494_v39  ;;  %1618 = vmatprep.mubr.f32.mxu1 %v627_v36  ;;  %v630_v44 = vmax.f32 %v500_v38, 0.0  ;;  %v643_v20 = vmax.f32 %v565_v15, 0.0  ;;  %v580_v28 = vadd.f32 %v1567_v47, %v2284_v13  ;;  %v937_v47 = vld [vmem:[#allocation8 + $0x10] sm:$0xff] }
 0x157   : > { %v1546_v42 = vpop.f32.mrf.mxu0  ;;  %1619 = vmatmul.mubr.f32.gmra.mxu1 %v628_v37  ;;  %v574_v54 = vpop.f32.mrf.mxu1  ;;  %1686 = vmatprep.subr.mxu0 %v937_v47 }
 0x158   : > { %v629_v43 = vmax.f32 %v495_v41, 0.0  ;;  %v510_v45 = vadd.f32 %v1546_v42, %v2284_v13  ;;  %v575_v21 = vadd.f32 %v2284_v13, %v574_v54  ;;  %v646_v31 = vmax.f32 %v580_v28, 0.0  ;;  %1687 = vmatpush3.msra.mxu0 %v937_v47 }
 0x159   : > { %v504_v46 = vpop.f32.mrf.mxu0  ;;  %v1570_v61 = vpop.f32.mrf.mxu1 }
 0x15a   : > { %v505_v48 = vadd.f32 %v2284_v13, %v504_v46  ;;  %1621 = vmatprep.mubr.f32.mxu1 %v629_v43  ;;  %v632_v51 = vmax.f32 %v510_v45, 0.0  ;;  %v645_v24 = vmax.f32 %v575_v21, 0.0  ;;  %v590_v32 = vadd.f32 %v1570_v61, %v2284_v13 }
 0x15b   : > { %v1549_v49 = vpop.f32.mrf.mxu0  ;;  %1622 = vmatmul.mubr.f32.gmra.mxu1 %v630_v44  ;;  %v584_v5 = vpop.f32.mrf.mxu1 }
 0x15c   : > { %v631_v50 = vmax.f32 %v505_v48, 0.0  ;;  %v520_v52 = vadd.f32 %v1549_v49, %v2284_v13  ;;  %v585_v26 = vadd.f32 %v2284_v13, %v584_v5  ;;  %v648_v36 = vmax.f32 %v590_v32, 0.0  ;;  %v936_v48 = vld [vmem:[#allocation8 + $0x8] sm:$0xff]  ;;  %v935_v49 = vld [vmem:[#allocation8] sm:$0xff] }
 0x15d   : > { %v514_v53 = vpop.f32.mrf.mxu0  ;;  %v1573_v12 = vpop.f32.mrf.mxu1  ;;  %1688 = vmatprep.subr.mxu0 %v936_v48 }
 0x15e   : > { %v515_v55 = vadd.f32 %v2284_v13, %v514_v53  ;;  %1624 = vmatprep.mubr.f32.mxu1 %v631_v50  ;;  %v634_v58 = vmax.f32 %v520_v52, 0.0  ;;  %v647_v29 = vmax.f32 %v585_v26, 0.0  ;;  %v600_v37 = vadd.f32 %v1573_v12, %v2284_v13  ;;  %1689 = vmatpush3.msra.mxu0 %v936_v48  ;;  %v2330_v50 = vld [vmem:[%s2491_s4] ss:$0 sm:$0xff] }
 0x15f   : > { %v1552_v56 = vpop.f32.mrf.mxu0  ;;  %1625 = vmatmul.mubr.f32.gmra.mxu1 %v632_v51  ;;  %v594_v19 = vpop.f32.mrf.mxu1  ;;  %1690 = vmatprep.subr.mxu0 %v935_v49 }
 0x160   : > { %v633_v57 = vmax.f32 %v515_v55, 0.0  ;;  %v530_v59 = vadd.f32 %v1552_v56, %v2284_v13  ;;  %v595_v30 = vadd.f32 %v2284_v13, %v594_v19  ;;  %v650_v41 = vmax.f32 %v600_v37, 0.0  ;;  %1691 = vmatpush3.msra.mxu0 %v935_v49 }
 0x161   : > { %v524_v60 = vpop.f32.mrf.mxu0  ;;  %v1576_v23 = vpop.f32.mrf.mxu1 }
 0x162   : > { %v525_v62 = vadd.f32 %v2284_v13, %v524_v60  ;;  %1627 = vmatprep.mubr.f32.mxu1 %v633_v57  ;;  %v636_v2 = vmax.f32 %v530_v59, 0.0  ;;  %v649_v33 = vmax.f32 %v595_v30, 0.0  ;;  %v610_v42 = vadd.f32 %v1576_v23, %v2284_v13 }
 0x163   : > { %v1555_v63 = vpop.f32.mrf.mxu0  ;;  %1628 = vmatmul.mubr.f32.gmra.mxu1 %v634_v58  ;;  %v604_v25 = vpop.f32.mrf.mxu1 }
 0x164   : > { %v635_v0 = vmax.f32 %v525_v62, 0.0  ;;  %v540_v3 = vadd.f32 %v1555_v63, %v2284_v13  ;;  %v605_v35 = vadd.f32 %v2284_v13, %v604_v25  ;;  %v652_v44 = vmax.f32 %v610_v42, 0.0 }
 0x165   : > { %v534_v4 = vpop.f32.mrf.mxu0  ;;  %v1579_v34 = vpop.f32.mrf.mxu1 }
 0x166   : > { %v535_v6 = vadd.f32 %v2284_v13, %v534_v4  ;;  %1630 = vmatprep.mubr.f32.mxu1 %v635_v0  ;;  %v638_v10 = vmax.f32 %v540_v3, 0.0  ;;  %v651_v39 = vmax.f32 %v605_v35, 0.0  ;;  %v620_v45 = vadd.f32 %v1579_v34, %v2284_v13 }
 0x167   : > { %1631 = vmatmul.mubr.f32.gmra.mxu1 %v636_v2  ;;  %v614_v38 = vpop.f32.mrf.mxu1 }
 0x168   : > { %v637_v7 = vmax.f32 %v535_v6, 0.0  ;;  %v615_v40 = vadd.f32 %v2284_v13, %v614_v38  ;;  %v654_v46 = vmax.f32 %v620_v45, 0.0 }
 0x16a   : > { %1633 = vmatprep.mubr.f32.mxu1 %v637_v7  ;;  %v653_v43 = vmax.f32 %v615_v40, 0.0 }
 0x16b   : > { %1634 = vmatmul.mubr.f32.gmra.mxu1 %v638_v10 }
 0x16c   : > { %1636 = vmatprep.mubr.f32.mxu1 %v639_v8 }
 0x16f   : > { %1637 = vmatmul.mubr.f32.gmra.mxu1 %v640_v16 }
 0x170   : > { %1639 = vmatprep.mubr.f32.mxu1 %v641_v14 }
 0x173   : > { %1640 = vmatmul.mubr.f32.gmra.mxu1 %v642_v22 }
 0x174   : > { %1642 = vmatprep.mubr.f32.mxu1 %v643_v20 }
 0x177   : > { %1643 = vmatmul.mubr.f32.gmra.mxu1 %v644_v27 }
 0x178   : > { %1645 = vmatprep.mubr.f32.mxu1 %v645_v24 }
 0x17b   : > { %1646 = vmatmul.mubr.f32.gmra.mxu1 %v646_v31 }
 0x17c   : > { %1648 = vmatprep.mubr.f32.mxu1 %v647_v29 }
 0x17f   : > { %1649 = vmatmul.mubr.f32.gmra.mxu1 %v648_v36 }
 0x180   : > { %1651 = vmatprep.mubr.f32.mxu1 %v649_v33 }
 0x183   : > { %1652 = vmatmul.mubr.f32.gmra.mxu1 %v650_v41 }
 0x184   : > { %1654 = vmatprep.mubr.f32.mxu1 %v651_v39 }
 0x187   : > { %1655 = vmatmul.mubr.f32.gmra.mxu1 %v652_v44 }
 0x188   : > { %1657 = vmatprep.mubr.f32.mxu1 %v653_v43 }
 0x18b   : > { %1658 = vmatmul.mubr.f32.gmra.mxu1 %v654_v46 }
 0x20f   : > { %v1614_v51 = vpop.f32.mrf.mxu1 }
 0x210   : > { %v750_v13 = vadd.f32 %v1614_v51, %v2330_v50 }
 0x211   : > { %v744_v52 = vpop.f32.mrf.mxu1 }
 0x212   : > { %v745_v53 = vadd.f32 %v2330_v50, %v744_v52  ;;  %v904_v56 = vmax.f32 %v750_v13, 0.0 }
 0x213   : > { %v1617_v54 = vpop.f32.mrf.mxu1 }
 0x214   : > { %v903_v55 = vmax.f32 %v745_v53, 0.0  ;;  %v760_v57 = vadd.f32 %v1617_v54, %v2330_v50 }
 0x215   : > { %v754_v58 = vpop.f32.mrf.mxu1 }
 0x216   : > { %v755_v59 = vadd.f32 %v2330_v50, %v754_v58  ;;  %1692 = vmatprep.mubr.f32.mxu0 %v903_v55  ;;  %v906_v62 = vmax.f32 %v760_v57, 0.0 }
 0x217   : > { %v1620_v60 = vpop.f32.mrf.mxu1  ;;  %1693 = vmatmul.mubr.f32.vlgmr.msra.gmra.mxu0 %v904_v56 }
 0x218   : > { %v905_v61 = vmax.f32 %v755_v59, 0.0  ;;  %v770_v63 = vadd.f32 %v1620_v60, %v2330_v50 }
 0x219   : > { %v764_v0 = vpop.f32.mrf.mxu1 }
 0x21a   : > { %v765_v1 = vadd.f32 %v2330_v50, %v764_v0  ;;  %1695 = vmatprep.mubr.f32.mxu0 %v905_v61  ;;  %v908_v4 = vmax.f32 %v770_v63, 0.0 }
 0x21b   : > { %v1623_v2 = vpop.f32.mrf.mxu1  ;;  %1696 = vmatmul.mubr.f32.gmra.mxu0 %v906_v62 }
 0x21c   : > { %v907_v3 = vmax.f32 %v765_v1, 0.0  ;;  %v780_v5 = vadd.f32 %v1623_v2, %v2330_v50 }
 0x21d   : > { %v774_v6 = vpop.f32.mrf.mxu1 }
 0x21e   : > { %v775_v7 = vadd.f32 %v2330_v50, %v774_v6  ;;  %1698 = vmatprep.mubr.f32.mxu0 %v907_v3  ;;  %v910_v10 = vmax.f32 %v780_v5, 0.0 }
 0x21f   : > { %v1626_v8 = vpop.f32.mrf.mxu1  ;;  %1699 = vmatmul.mubr.f32.gmra.mxu0 %v908_v4 }
 0x220   : > { %v909_v9 = vmax.f32 %v775_v7, 0.0  ;;  %v790_v11 = vadd.f32 %v1626_v8, %v2330_v50 }
 0x221   : > { %v784_v12 = vpop.f32.mrf.mxu1 }
 0x222   : > { %v785_v14 = vadd.f32 %v2330_v50, %v784_v12  ;;  %1701 = vmatprep.mubr.f32.mxu0 %v909_v9  ;;  %v912_v18 = vmax.f32 %v790_v11, 0.0 }
 0x223   : > { %v1629_v15 = vpop.f32.mrf.mxu1  ;;  %1702 = vmatmul.mubr.f32.gmra.mxu0 %v910_v10 }
 0x224   : > { %v911_v16 = vmax.f32 %v785_v14, 0.0  ;;  %v800_v19 = vadd.f32 %v1629_v15, %v2330_v50 }
 0x225   : > { %v794_v20 = vpop.f32.mrf.mxu1 }
 0x226   : > { %v795_v21 = vadd.f32 %v2330_v50, %v794_v20  ;;  %1704 = vmatprep.mubr.f32.mxu0 %v911_v16  ;;  %v914_v23 = vmax.f32 %v800_v19, 0.0 }
 0x227   : > { %v1632_v22 = vpop.f32.mrf.mxu1  ;;  %1705 = vmatmul.mubr.f32.gmra.mxu0 %v912_v18 }
 0x228   : > { %v913_v17 = vmax.f32 %v795_v21, 0.0  ;;  %v810_v24 = vadd.f32 %v1632_v22, %v2330_v50  ;;  %v2367_v21 = vld [vmem:[%s2493_s6] ss:$0 sm:$0xff] }
 0x229   : > { %v804_v26 = vpop.f32.mrf.mxu1 }
 0x22a   : > { %v805_v27 = vadd.f32 %v2330_v50, %v804_v26  ;;  %1707 = vmatprep.mubr.f32.mxu0 %v913_v17  ;;  %v916_v29 = vmax.f32 %v810_v24, 0.0 }
 0x22b   : > { %v1635_v28 = vpop.f32.mrf.mxu1  ;;  %1708 = vmatmul.mubr.f32.gmra.mxu0 %v914_v23 }
 0x22c   : > { %v915_v25 = vmax.f32 %v805_v27, 0.0  ;;  %v820_v30 = vadd.f32 %v1635_v28, %v2330_v50 }
 0x22d   : > { %v814_v31 = vpop.f32.mrf.mxu1 }
 0x22e   : > { %v815_v32 = vadd.f32 %v2330_v50, %v814_v31  ;;  %1710 = vmatprep.mubr.f32.mxu0 %v915_v25  ;;  %v918_v35 = vmax.f32 %v820_v30, 0.0 }
 0x22f   : > { %v1638_v34 = vpop.f32.mrf.mxu1  ;;  %1711 = vmatmul.mubr.f32.gmra.mxu0 %v916_v29 }
 0x230   : > { %v917_v33 = vmax.f32 %v815_v32, 0.0  ;;  %v830_v36 = vadd.f32 %v1638_v34, %v2330_v50 }
 0x231   : > { %v824_v37 = vpop.f32.mrf.mxu1 }
 0x232   : > { %v825_v38 = vadd.f32 %v2330_v50, %v824_v37  ;;  %1713 = vmatprep.mubr.f32.mxu0 %v917_v33  ;;  %v920_v41 = vmax.f32 %v830_v36, 0.0 }
 0x233   : > { %v1641_v39 = vpop.f32.mrf.mxu1  ;;  %1714 = vmatmul.mubr.f32.gmra.mxu0 %v918_v35 }
 0x234   : > { %v919_v40 = vmax.f32 %v825_v38, 0.0  ;;  %v840_v42 = vadd.f32 %v1641_v39, %v2330_v50 }
 0x235   : > { %v834_v43 = vpop.f32.mrf.mxu1 }
 0x236   : > { %v835_v44 = vadd.f32 %v2330_v50, %v834_v43  ;;  %1716 = vmatprep.mubr.f32.mxu0 %v919_v40  ;;  %v922_v47 = vmax.f32 %v840_v42, 0.0 }
 0x237   : > { %v1644_v45 = vpop.f32.mrf.mxu1  ;;  %1717 = vmatmul.mubr.f32.gmra.mxu0 %v920_v41 }
 0x238   : > { %v921_v46 = vmax.f32 %v835_v44, 0.0  ;;  %v850_v48 = vadd.f32 %v1644_v45, %v2330_v50 }
 0x239   : > { %v844_v49 = vpop.f32.mrf.mxu1 }
 0x23a   : > { %v845_v51 = vadd.f32 %v2330_v50, %v844_v49  ;;  %1719 = vmatprep.mubr.f32.mxu0 %v921_v46  ;;  %v924_v53 = vmax.f32 %v850_v48, 0.0 }
 0x23b   : > { %v1647_v13 = vpop.f32.mrf.mxu1  ;;  %1720 = vmatmul.mubr.f32.gmra.mxu0 %v922_v47 }
 0x23c   : > { %v923_v52 = vmax.f32 %v845_v51, 0.0  ;;  %v860_v54 = vadd.f32 %v1647_v13, %v2330_v50 }
 0x23d   : > { %v854_v55 = vpop.f32.mrf.mxu1 }
 0x23e   : > { %v855_v56 = vadd.f32 %v2330_v50, %v854_v55  ;;  %1722 = vmatprep.mubr.f32.mxu0 %v923_v52  ;;  %v926_v59 = vmax.f32 %v860_v54, 0.0 }
 0x23f   : > { %v1650_v57 = vpop.f32.mrf.mxu1  ;;  %1723 = vmatmul.mubr.f32.gmra.mxu0 %v924_v53 }
 0x240   : > { %v925_v58 = vmax.f32 %v855_v56, 0.0  ;;  %v870_v60 = vadd.f32 %v1650_v57, %v2330_v50 }
 0x241   : > { %v864_v61 = vpop.f32.mrf.mxu1 }
 0x242   : > { %v865_v62 = vadd.f32 %v2330_v50, %v864_v61  ;;  %1725 = vmatprep.mubr.f32.mxu0 %v925_v58  ;;  %v928_v1 = vmax.f32 %v870_v60, 0.0 }
 0x243   : > { %v1653_v63 = vpop.f32.mrf.mxu1  ;;  %1726 = vmatmul.mubr.f32.gmra.mxu0 %v926_v59 }
 0x244   : > { %v927_v0 = vmax.f32 %v865_v62, 0.0  ;;  %v880_v2 = vadd.f32 %v1653_v63, %v2330_v50 }
 0x245   : > { %v874_v3 = vpop.f32.mrf.mxu1 }
 0x246   : > { %v875_v4 = vadd.f32 %v2330_v50, %v874_v3  ;;  %1728 = vmatprep.mubr.f32.mxu0 %v927_v0  ;;  %v930_v7 = vmax.f32 %v880_v2, 0.0 }
 0x247   : > { %v1656_v5 = vpop.f32.mrf.mxu1  ;;  %1729 = vmatmul.mubr.f32.gmra.mxu0 %v928_v1 }
 0x248   : > { %v929_v6 = vmax.f32 %v875_v4, 0.0  ;;  %v890_v8 = vadd.f32 %v1656_v5, %v2330_v50 }
 0x249   : > { %v884_v9 = vpop.f32.mrf.mxu1 }
 0x24a   : > { %v885_v10 = vadd.f32 %v2330_v50, %v884_v9  ;;  %1731 = vmatprep.mubr.f32.mxu0 %v929_v6  ;;  %v932_v14 = vmax.f32 %v890_v8, 0.0 }
 0x24b   : > { %v1659_v11 = vpop.f32.mrf.mxu1  ;;  %1732 = vmatmul.mubr.f32.gmra.mxu0 %v930_v7 }
 0x24c   : > { %v931_v12 = vmax.f32 %v885_v10, 0.0  ;;  %v900_v15 = vadd.f32 %v1659_v11, %v2330_v50 }
 0x24d   : > { %v894_v16 = vpop.f32.mrf.mxu1 }
 0x24e   : > { %v895_v18 = vadd.f32 %v2330_v50, %v894_v16  ;;  %1734 = vmatprep.mubr.f32.mxu0 %v931_v12  ;;  %v934_v20 = vmax.f32 %v900_v15, 0.0 }
 0x24f   : > { %1735 = vmatmul.mubr.f32.gmra.mxu0 %v932_v14 }
 0x250   : > { %v933_v19 = vmax.f32 %v895_v18, 0.0 }
 0x252   : > { %1737 = vmatprep.mubr.f32.mxu0 %v933_v19 }
 0x253   : > { %1738 = vmatmul.mubr.f32.gmra.mxu0 %v934_v20 }
 0x2d7   : > { %v1694_v22 = vpop.f32.mrf.mxu0 }
 0x2d8   : > { %v1030_v17 = vadd.f32 %v1694_v22, %v2367_v21 }
 0x2d9   : > { %v1024_v23 = vpop.f32.mrf.mxu0 }
 0x2da   : > { %1184 = vst [vmem:[%s2372_s11 + $0x8] sm:$0xff] %v1030_v17  ;;  %v1025_v50 = vadd.f32 %v2367_v21, %v1024_v23 }
 0x2db   : > { %v1697_v24 = vpop.f32.mrf.mxu0 }
 0x2dc   : > { %1183 = vst [vmem:[%s2372_s11] sm:$0xff] %v1025_v50  ;;  %v1040_v26 = vadd.f32 %v1697_v24, %v2367_v21 }
 0x2dd   : > { %v1034_v27 = vpop.f32.mrf.mxu0 }
 0x2de   : > { %1186 = vst [vmem:[%s2372_s11 + $0x18] sm:$0xff] %v1040_v26  ;;  %v1035_v28 = vadd.f32 %v2367_v21, %v1034_v27 }
 0x2df   : > { %v1700_v25 = vpop.f32.mrf.mxu0 }
 0x2e0   : > { %1185 = vst [vmem:[%s2372_s11 + $0x10] sm:$0xff] %v1035_v28  ;;  %v1050_v29 = vadd.f32 %v1700_v25, %v2367_v21 }
 0x2e1   : > { %v1044_v30 = vpop.f32.mrf.mxu0 }
 0x2e2   : > { %1188 = vst [vmem:[%s2372_s11 + $0x28] sm:$0xff] %v1050_v29  ;;  %v1045_v31 = vadd.f32 %v2367_v21, %v1044_v30 }
 0x2e3   : > { %v1703_v32 = vpop.f32.mrf.mxu0 }
 0x2e4   : > { %1187 = vst [vmem:[%s2372_s11 + $0x20] sm:$0xff] %v1045_v31  ;;  %v1060_v34 = vadd.f32 %v1703_v32, %v2367_v21 }
 0x2e5   : > { %v1054_v33 = vpop.f32.mrf.mxu0 }
 0x2e6   : > { %1190 = vst [vmem:[%s2372_s11 + $0x38] sm:$0xff] %v1060_v34  ;;  %v1055_v35 = vadd.f32 %v2367_v21, %v1054_v33 }
 0x2e7   : > { %v1706_v36 = vpop.f32.mrf.mxu0 }
 0x2e8   : > { %1189 = vst [vmem:[%s2372_s11 + $0x30] sm:$0xff] %v1055_v35  ;;  %v1070_v37 = vadd.f32 %v1706_v36, %v2367_v21 }
 0x2e9   : > { %v1064_v38 = vpop.f32.mrf.mxu0 }
 0x2ea   : > { %1192 = vst [vmem:[%s2372_s11 + $0x48] sm:$0xff] %v1070_v37  ;;  %v1065_v39 = vadd.f32 %v2367_v21, %v1064_v38 }
 0x2eb   : > { %v1709_v40 = vpop.f32.mrf.mxu0 }
 0x2ec   : > { %1191 = vst [vmem:[%s2372_s11 + $0x40] sm:$0xff] %v1065_v39  ;;  %v1080_v41 = vadd.f32 %v1709_v40, %v2367_v21 }
 0x2ed   : > { %v1074_v42 = vpop.f32.mrf.mxu0 }
 0x2ee   : > { %1194 = vst [vmem:[%s2372_s11 + $0x58] sm:$0xff] %v1080_v41  ;;  %v1075_v43 = vadd.f32 %v2367_v21, %v1074_v42 }
 0x2ef   : > { %v1712_v44 = vpop.f32.mrf.mxu0 }
 0x2f0   : > { %1193 = vst [vmem:[%s2372_s11 + $0x50] sm:$0xff] %v1075_v43  ;;  %v1090_v45 = vadd.f32 %v1712_v44, %v2367_v21 }
 0x2f1   : > { %v1084_v46 = vpop.f32.mrf.mxu0 }
 0x2f2   : > { %1196 = vst [vmem:[%s2372_s11 + $0x68] sm:$0xff] %v1090_v45  ;;  %v1085_v47 = vadd.f32 %v2367_v21, %v1084_v46 }
 0x2f3   : > { %v1715_v48 = vpop.f32.mrf.mxu0 }
 0x2f4   : > { %1195 = vst [vmem:[%s2372_s11 + $0x60] sm:$0xff] %v1085_v47  ;;  %v1100_v49 = vadd.f32 %v1715_v48, %v2367_v21 }
 0x2f5   : > { %v1094_v51 = vpop.f32.mrf.mxu0 }
 0x2f6   : > { %1198 = vst [vmem:[%s2372_s11 + $0x78] sm:$0xff] %v1100_v49  ;;  %v1095_v13 = vadd.f32 %v2367_v21, %v1094_v51 }
 0x2f7   : > { %v1718_v52 = vpop.f32.mrf.mxu0 }
 0x2f8   : > { %1197 = vst [vmem:[%s2372_s11 + $0x70] sm:$0xff] %v1095_v13  ;;  %v1110_v53 = vadd.f32 %v1718_v52, %v2367_v21 }
 0x2f9   : > { %v1104_v54 = vpop.f32.mrf.mxu0 }
 0x2fa   : > { %1200 = vst [vmem:[%s2372_s11 + $0x88] sm:$0xff] %v1110_v53  ;;  %v1105_v55 = vadd.f32 %v2367_v21, %v1104_v54 }
 0x2fb   : > { %v1721_v56 = vpop.f32.mrf.mxu0 }
 0x2fc   : > { %1199 = vst [vmem:[%s2372_s11 + $0x80] sm:$0xff] %v1105_v55  ;;  %v1120_v57 = vadd.f32 %v1721_v56, %v2367_v21 }
 0x2fd   : > { %v1114_v58 = vpop.f32.mrf.mxu0 }
 0x2fe   : > { %1202 = vst [vmem:[%s2372_s11 + $0x98] sm:$0xff] %v1120_v57  ;;  %v1115_v59 = vadd.f32 %v2367_v21, %v1114_v58 }
 0x2ff   : > { %v1724_v60 = vpop.f32.mrf.mxu0 }
 0x300   : > { %1201 = vst [vmem:[%s2372_s11 + $0x90] sm:$0xff] %v1115_v59  ;;  %v1130_v61 = vadd.f32 %v1724_v60, %v2367_v21 }
 0x301   : > { %v1124_v62 = vpop.f32.mrf.mxu0 }
 0x302   : > { %1204 = vst [vmem:[%s2372_s11 + $0xa8] sm:$0xff] %v1130_v61  ;;  %v1125_v63 = vadd.f32 %v2367_v21, %v1124_v62 }
 0x303   : > { %v1727_v0 = vpop.f32.mrf.mxu0 }
 0x304   : > { %1203 = vst [vmem:[%s2372_s11 + $0xa0] sm:$0xff] %v1125_v63  ;;  %v1140_v1 = vadd.f32 %v1727_v0, %v2367_v21 }
 0x305   : > { %v1134_v2 = vpop.f32.mrf.mxu0 }
 0x306   : > { %1206 = vst [vmem:[%s2372_s11 + $0xb8] sm:$0xff] %v1140_v1  ;;  %v1135_v3 = vadd.f32 %v2367_v21, %v1134_v2 }
 0x307   : > { %v1730_v4 = vpop.f32.mrf.mxu0 }
 0x308   : > { %1205 = vst [vmem:[%s2372_s11 + $0xb0] sm:$0xff] %v1135_v3  ;;  %v1150_v5 = vadd.f32 %v1730_v4, %v2367_v21 }
 0x309   : > { %v1144_v6 = vpop.f32.mrf.mxu0 }
 0x30a   : > { %1208 = vst [vmem:[%s2372_s11 + $0xc8] sm:$0xff] %v1150_v5  ;;  %v1145_v7 = vadd.f32 %v2367_v21, %v1144_v6 }
 0x30b   : > { %v1733_v8 = vpop.f32.mrf.mxu0 }
 0x30c   : > { %1207 = vst [vmem:[%s2372_s11 + $0xc0] sm:$0xff] %v1145_v7  ;;  %v1160_v9 = vadd.f32 %v1733_v8, %v2367_v21 }
 0x30d   : > { %v1154_v10 = vpop.f32.mrf.mxu0 }
 0x30e   : > { %1210 = vst [vmem:[%s2372_s11 + $0xd8] sm:$0xff] %v1160_v9  ;;  %v1155_v11 = vadd.f32 %v2367_v21, %v1154_v10 }
 0x30f   : > { %v1736_v12 = vpop.f32.mrf.mxu0 }
 0x310   : > { %1209 = vst [vmem:[%s2372_s11 + $0xd0] sm:$0xff] %v1155_v11  ;;  %v1170_v14 = vadd.f32 %v1736_v12, %v2367_v21 }
 0x311   : > { %v1164_v15 = vpop.f32.mrf.mxu0 }
 0x312   : > { %1212 = vst [vmem:[%s2372_s11 + $0xe8] sm:$0xff] %v1170_v14  ;;  %v1165_v16 = vadd.f32 %v2367_v21, %v1164_v15 }
 0x313   : > { %v1739_v18 = vpop.f32.mrf.mxu0 }
 0x314   : > { %1211 = vst [vmem:[%s2372_s11 + $0xe0] sm:$0xff] %v1165_v16  ;;  %v1180_v19 = vadd.f32 %v1739_v18, %v2367_v21 }
 0x315   : > { %v1174_v20 = vpop.f32.mrf.mxu0 }
 0x316   : > { %1214 = vst [vmem:[%s2372_s11 + $0xf8] sm:$0xff] %v1180_v19  ;;  %v1175_v22 = vadd.f32 %v2367_v21, %v1174_v20 }
 0x318   : > { %1213 = vst [vmem:[%s2372_s11 + $0xf0] sm:$0xff] %v1175_v22 }
 0x319   : > { %1972 = shalt.err (!%p1969_p10)
}
 0x31a   : > { %s1973_s10 = scalar_lea.hbm %s2439_s1, 4096  ;;  %s1977_s29 = scalar_lea.hbm %s2494_s7, 8192 }
 0x31b   : > { %p1974_p6 = scmp.ne.s32.totalorder %s2439_s1, %s1973_s10  ;;  %p1978_p3 = scmp.lt.s32.totalorder %s2439_s1, %s2494_s7 }
 0x31c   : > { %p1979_p11 = scmp.lt.s32.totalorder %s1977_s29, %s1973_s10 }
 0x31d   : > { %p1975_p4 = pnand %p1974_p6, %p2517_p1 }
 0x31e   : > { %p1980_p5 = por %p1979_p11, %p1978_p3 }
 0x31f   : > { %p1976_p8 = pneg %p1975_p4 }
 0x321   : > { %p1981_p7 = pnand %p1980_p5, %p1976_p8 }
 0x323   : > { %1984 = shalt.err (!%p1981_p7)
}
 0x324   : > { %s2040_s18 = smov 128   ;;  %s2041_s23 = smov 8  }
 0x325   : > { %1786 = dma.vmem_to_hbm [thread:$0]  (%p2517_p1), %s2441_s22, 4096, %s2439_s1, %s1216_s28, %s2040_s18, %s2040_s18, %s2041_s23  }
 0x326 PF: > { %s1244_s16 = sand.u32 1, %s2019_s24   ;;  %p2518_p12 = scmp.ne.s32.totalorder %s2503_s8, 0 }
 0x327   : > { %p2519_p9 = scmp.ge.s32.totalorder %s2031_s27, 2  ;;  %s1245_s12 = scalar_lea.sflag [#allocation4], %s1244_s16 }
 0x329   : > { %p1803_p13 = pnand %p2519_p9, %p2518_p12 }
 0x32b   : > { %p1804_p0 = pneg %p1803_p13 }
 0x32d   : > { %2014 = dma.done.wait (%p1804_p0), %s1245_s12, 4096  }
 0x32e   : > { %2016 = vsyncadd (%p1804_p0), %s1245_s12, 4294963200  ;;  %p22_p2 = scmp.ge.s32.totalorder %s2171_s14, 4   ;;  %s2520_s24 = smov %s2023_s25 }
 0x32f   : > { %s2521_s25 = smov %s2027_s26  ;;  %s2522_s26 = smov %s2181_s17 }
 0x330   : > { %s2523_s27 = smov %s2171_s14  ;;  %24 = sbr.rel (!%p22_p2) target bundleno = 9 (0x9), region = 105 }
 0x335   :  { %1250 = vsyncpa [#allocation3], 1 }
 0x336   :  { %1252 = vsyncpa [#allocation3 + $0x1], 1 }
 0x337   :  { %1253 = vsyncpa [#allocation6], 1 }
 0x338   :  { %1254 = vsyncpa [#allocation9], 1 }
 0x339   :  { %1255 = vsyncpa [#allocation4], 1 }
 0x33a   :  { %1257 = vsyncpa [#allocation4 + $0x1], 1 }

</bundles_post_ra>
